<compile_context>
chip_gen: v5e
topology: v5e:2x2
jax: 0.10.0
libtpu: 0.0.40
codegen_flags: <defaults>
</compile_context>

<pallas_src>
import functools

import jax
import jax.numpy as jnp
from jax.experimental import pallas as pl
from jax.experimental.pallas import tpu as pltpu


# ---------------------------------------------------------------------------
# Kernel A (small-shape path): fully fused conv -> stats -> BN -> ReLU.
# Layout:  p[n]  : [KK, HW]   (HW on lanes, lane-dense)
#          w     : [Cout, KK]
#          o[n]  : [Cout, HW] (reshapes straight to NCHW, no transpose)
# ---------------------------------------------------------------------------
def _fused_conv_bn_relu_kernel(p_ref, w_ref, g_ref, b_ref, o_ref, *, count, eps):
    n_batch = p_ref.shape[0]
    cout = w_ref.shape[0]
    w = w_ref[...]

    ch_sum = jnp.zeros((cout, 1), jnp.float32)
    ch_sq = jnp.zeros((cout, 1), jnp.float32)

    # Pass 1: conv matmul per batch element; stash y in the VMEM-resident
    # output ref and accumulate per-channel sum / sum-of-squares.
    for n in range(n_batch):
        y = jnp.dot(w, p_ref[n], preferred_element_type=jnp.float32)  # [Cout, HW]
        o_ref[n] = y
        ch_sum = ch_sum + jnp.sum(y, axis=1, keepdims=True)
        ch_sq = ch_sq + jnp.sum(y * y, axis=1, keepdims=True)

    inv_count = 1.0 / count
    mean = ch_sum * inv_count
    var = ch_sq * inv_count - mean * mean          # biased var (PyTorch training BN)
    inv_std = jax.lax.rsqrt(var + eps)
    scale = g_ref[...] * inv_std                   # [Cout, 1]
    shift = b_ref[...] - mean * scale

    # Pass 2: affine BN + ReLU, in place on the VMEM output buffer.
    for n in range(n_batch):
        o_ref[n] = jnp.maximum(o_ref[n] * scale + shift, 0.0)


# ---------------------------------------------------------------------------
# Kernel B (tiled path, call 1): conv matmul fused with per-tile BN partial
# statistics (per-channel sum / sum-of-squares written per grid step, so both
# grid axes stay "parallel").
# ---------------------------------------------------------------------------
def _conv_stats_kernel(p_ref, w_ref, y_ref, s_ref, q_ref):
    y = jnp.dot(w_ref[...], p_ref[0], preferred_element_type=jnp.float32)  # [Cout, t_hw]
    y_ref[0] = y
    s_ref[0, 0] = jnp.sum(y, axis=1, keepdims=True)      # [Cout, 1]
    q_ref[0, 0] = jnp.sum(y * y, axis=1, keepdims=True)  # [Cout, 1]


# ---------------------------------------------------------------------------
# Kernel C (tiled path, call 2): fused affine BatchNorm + ReLU (lane-dense).
# ---------------------------------------------------------------------------
def _bn_relu_kernel(y_ref, scale_ref, shift_ref, o_ref):
    o_ref[0] = jnp.maximum(y_ref[0] * scale_ref[...] + shift_ref[...], 0.0)


def conv_brunch_forward(x_nchw, weight_ochw, bias, gamma, beta,
                        kernel_size=3, eps=1e-5,
                        mxu_dtype=jnp.float32, force_tiled=False):
    """ConvBrunch forward. x: [N, Cin, H, W] -> [N, Cout, Ho, Wo] (NCHW)."""
    # Conv bias is exactly cancelled by training-mode BatchNorm over the same
    # tensor (mean shifts by the bias, variance unchanged) -> intentionally
    # not applied (identical output, less work).
    del bias

    N, Cin, H, W = x_nchw.shape
    Cout = weight_ochw.shape[0]
    k = kernel_size
    pad = (k - 1) // 2
    Ho = H + 2 * pad - k + 1
    Wo = W + 2 * pad - k + 1
    KK = k * k * Cin
    HW = Ho * Wo
    count = float(N * HW)

    # ----- XLA glue: channels-major im2col (spatial axis stays fast/last) -----
    # p[n, (ky*k+kx)*Cin + c, ho*Wo + wo] = x_padded[n, c, ho+ky, wo+kx]
    xpad = jnp.pad(x_nchw.astype(jnp.float32),
                   ((0, 0), (0, 0), (pad, pad), (pad, pad)))
    taps = [xpad[:, :, dy:dy + Ho, dx:dx + Wo]
            for dy in range(k) for dx in range(k)]           # each [N, Cin, Ho, Wo]
    p = jnp.stack(taps, axis=1).reshape(N, KK, HW)           # [N, KK, HW]
    # weight [Cout, Cin, kh, kw] -> [Cout, kh, kw, Cin] -> [Cout, KK] (same kk order)
    w_cm = jnp.transpose(weight_ochw.astype(jnp.float32),
                         (0, 2, 3, 1)).reshape(Cout, KK)

    p = p.astype(mxu_dtype)          # set bf16 on v6e/v7x for MXU-rate + 1/2 bytes
    w_cm = w_cm.astype(mxu_dtype)
    g_col = gamma.astype(jnp.float32).reshape(Cout, 1)
    b_col = beta.astype(jnp.float32).reshape(Cout, 1)

    itemsize = p.dtype.itemsize
    fused_bytes = p.size * itemsize + 2 * N * Cout * HW * 4 + Cout * KK * itemsize
    use_fused = (not force_tiled) and (fused_bytes <= 8 * 1024 * 1024)

    # =================== small-shape path: single fused call ===================
    if use_fused:
        out_cm = pl.pallas_call(
            functools.partial(_fused_conv_bn_relu_kernel, count=count, eps=eps),
            out_shape=jax.ShapeDtypeStruct((N, Cout, HW), jnp.float32),
            grid=(1,),
            in_specs=[
                pl.BlockSpec((N, KK, HW), lambda i: (0, 0, 0)),
                pl.BlockSpec((Cout, KK), lambda i: (0, 0)),
                pl.BlockSpec((Cout, 1), lambda i: (0, 0)),
                pl.BlockSpec((Cout, 1), lambda i: (0, 0)),
            ],
            out_specs=pl.BlockSpec((N, Cout, HW), lambda i: (0, 0, 0)),
            compiler_params=pltpu.CompilerParams(
                dimension_semantics=("arbitrary",),
                vmem_limit_bytes=32 * 1024 * 1024),
        )(p, w_cm, g_col, b_col)
        return out_cm.reshape(N, Cout, Ho, Wo)

    # =================== general tiled path: two fused calls ===================
    # lane-tile size from a VMEM budget (double-buffered p + y columns),
    # capped at 2048 and sized v7x-safe (64 MiB VMEM).
    bytes_per_lane = KK * itemsize + Cout * 4
    budget = 24 * 1024 * 1024
    t_hw = (budget // (2 * bytes_per_lane) // 128) * 128
    t_hw = max(128, min(2048, t_hw))
    t_hw = min(t_hw, ((HW + 127) // 128) * 128)
    HW_pad = ((HW + t_hw - 1) // t_hw) * t_hw
    n_hw = HW_pad // t_hw
    if HW_pad != HW:
        # zero-padded columns give y == 0 (no bias added) -> stats unaffected
        p = jnp.pad(p, ((0, 0), (0, 0), (0, HW_pad - HW)))

    # ---- call 1: conv matmul + per-tile BN partial statistics ----
    y, s_part, q_part = pl.pallas_call(
        _conv_stats_kernel,
        out_shape=(jax.ShapeDtypeStruct((N, Cout, HW_pad), jnp.float32),
                   jax.ShapeDtypeStruct((N, n_hw, Cout, 1), jnp.float32),
                   jax.ShapeDtypeStruct((N, n_hw, Cout, 1), jnp.float32)),
        grid=(N, n_hw),
        in_specs=[
            pl.BlockSpec((1, KK, t_hw), lambda n, j: (n, 0, j)),
            pl.BlockSpec((Cout, KK), lambda n, j: (0, 0)),
        ],
        out_specs=(
            pl.BlockSpec((1, Cout, t_hw), lambda n, j: (n, 0, j)),
            pl.BlockSpec((1, 1, Cout, 1), lambda n, j: (n, j, 0, 0)),
            pl.BlockSpec((1, 1, Cout, 1), lambda n, j: (n, j, 0, 0)),
        ),
        compiler_params=pltpu.CompilerParams(
            dimension_semantics=("parallel", "parallel"),
            vmem_limit_bytes=48 * 1024 * 1024),
    )(p, w_cm)

    # ---- glue: combine partials, fold BN into per-channel scale/shift ----
    ch_sum = jnp.sum(s_part, axis=(0, 1))            # [Cout, 1]
    ch_sq = jnp.sum(q_part, axis=(0, 1))             # [Cout, 1]
    mean = ch_sum / count
    var = ch_sq / count - mean * mean                # biased var (PyTorch training BN)
    inv_std = jax.lax.rsqrt(var + eps)
    scale = g_col * inv_std
    shift = b_col - mean * scale

    # ---- call 2: fused BN apply + ReLU (lane-dense output) ----
    out = pl.pallas_call(
        _bn_relu_kernel,
        out_shape=jax.ShapeDtypeStruct((N, Cout, HW_pad), jnp.float32),
        grid=(N, n_hw),
        in_specs=[
            pl.BlockSpec((1, Cout, t_hw), lambda n, j: (n, 0, j)),
            pl.BlockSpec((Cout, 1), lambda n, j: (0, 0)),
            pl.BlockSpec((Cout, 1), lambda n, j: (0, 0)),
        ],
        out_specs=pl.BlockSpec((1, Cout, t_hw), lambda n, j: (n, 0, j)),
        compiler_params=pltpu.CompilerParams(
            dimension_semantics=("parallel", "parallel"),
            vmem_limit_bytes=48 * 1024 * 1024),
    )(y, scale, shift)

    return out[:, :, :HW].reshape(N, Cout, Ho, Wo)


# ---------------------------------------------------------------------------
# Pure-JAX reference (Conv2d + bias -> training-mode BN -> ReLU) for checking.
# ---------------------------------------------------------------------------
def _reference_forward(x, weight, bias, gamma, beta, eps=1e-5):
    pad = (weight.shape[2] - 1) // 2
    y = jax.lax.conv_general_dilated(
        x, weight, window_strides=(1, 1), padding=((pad, pad), (pad, pad)),
        dimension_numbers=("NCHW", "OIHW", "NCHW"))
    y = y + bias.reshape(1, -1, 1, 1)
    mean = jnp.mean(y, axis=(0, 2, 3), keepdims=True)
    var = jnp.mean(jnp.square(y - mean), axis=(0, 2, 3), keepdims=True)
    y_hat = (y - mean) * jax.lax.rsqrt(var + eps)
    y_hat = y_hat * gamma.reshape(1, -1, 1, 1) + beta.reshape(1, -1, 1, 1)
    return jnp.maximum(y_hat, 0.0)


if __name__ == "__main__":
    # ConvBrunch(in_planes=4, out_planes=8, kernel_size=3)
    N, Cin, H, W = 2, 4, 16, 16
    Cout, k = 8, 3

    key = jax.random.PRNGKey(0)
    kx, kw, kb = jax.random.split(key, 3)

    x = jax.random.normal(kx, (N, Cin, H, W), dtype=jnp.float32)

    # deterministic parameter init (roughly PyTorch's kaiming-uniform scale)
    fan_in = Cin * k * k
    bound = 1.0 / float(fan_in) ** 0.5
    weight = jax.random.uniform(kw, (Cout, Cin, k, k), minval=-bound, maxval=bound,
                                dtype=jnp.float32)
    bias = jax.random.uniform(kb, (Cout,), minval=-bound, maxval=bound,
                              dtype=jnp.float32)
    gamma = jnp.ones((Cout,), dtype=jnp.float32)   # BatchNorm weight
    beta = jnp.zeros((Cout,), dtype=jnp.float32)   # BatchNorm bias

    fwd = jax.jit(conv_brunch_forward, static_argnames=("kernel_size",))
    out = jax.block_until_ready(fwd(x, weight, bias, gamma, beta, kernel_size=k))
    assert out.shape == (N, Cout, H, W)

    # also exercise the general tiled (2-call) fallback on the same problem
    out_tiled = jax.block_until_ready(
        conv_brunch_forward(x, weight, bias, gamma, beta, kernel_size=k,
                            force_tiled=True))

    ref = jax.block_until_ready(_reference_forward(x, weight, bias, gamma, beta))
    err_fused = float(jnp.max(jnp.abs(out - ref)))
    err_tiled = float(jnp.max(jnp.abs(out_tiled - ref)))
    assert err_fused < 2e-3, f"fused path max abs err {err_fused}"
    assert err_tiled < 2e-3, f"tiled path max abs err {err_tiled}"

    print("KERNEL_OK")
</pallas_src>

<mosaic_0001>
module attributes {stable_mosaic.version = 11 : i64} {
  func.func @_fused_conv_bn_relu_kernel(%arg0: i32, %arg1: memref<2x36x256xf32, #tpu.memory_space<vmem>>, %arg2: memref<8x36xf32, #tpu.memory_space<vmem>>, %arg3: memref<8x1xf32, #tpu.memory_space<vmem>>, %arg4: memref<8x1xf32, #tpu.memory_space<vmem>>, %arg5: memref<2x8x256xf32, #tpu.memory_space<vmem>>) attributes {dimension_semantics = [#tpu.dimension_semantics<arbitrary>], iteration_bounds = array<i64: 1>, scalar_prefetch = 0 : i64, scratch_operands = 0 : i64, tpu.core_type = #tpu.core_type<tc>, window_params = [{pipeline_mode = #tpu.pipeline_mode<synchronous>, transform_indices = @transform_0, window_bounds = array<i64: 2, 36, 256>}, {pipeline_mode = #tpu.pipeline_mode<synchronous>, transform_indices = @transform_1, window_bounds = array<i64: 8, 36>}, {pipeline_mode = #tpu.pipeline_mode<synchronous>, transform_indices = @transform_2, window_bounds = array<i64: 8, 1>}, {pipeline_mode = #tpu.pipeline_mode<synchronous>, transform_indices = @transform_3, window_bounds = array<i64: 8, 1>}, {pipeline_mode = #tpu.pipeline_mode<synchronous>, transform_indices = @transform_4, window_bounds = array<i64: 2, 8, 256>}]} {
    %c0 = arith.constant 0 : index
    %c0_0 = arith.constant 0 : index
    %0 = vector.load %arg2[%c0, %c0_0] : memref<8x36xf32, #tpu.memory_space<vmem>>, vector<8x36xf32>
    %cst = arith.constant 0.000000e+00 : f32
    %1 = vector.broadcast %cst : f32 to vector<8x1xf32>
    %cst_1 = arith.constant 0.000000e+00 : f32
    %2 = vector.broadcast %cst_1 : f32 to vector<8x1xf32>
    %c0_2 = arith.constant 0 : index
    %c0_3 = arith.constant 0 : index
    %c0_4 = arith.constant 0 : index
    %3 = vector.load %arg1[%c0_2, %c0_3, %c0_4] : memref<2x36x256xf32, #tpu.memory_space<vmem>>, vector<1x36x256xf32>
    %4 = vector.shape_cast %3 : vector<1x36x256xf32> to vector<36x256xf32>
    %cst_5 = arith.constant dense<0.000000e+00> : vector<8x256xf32>
    %5 = tpu.matmul %0, %4, %cst_5 {dimension_numbers = #tpu.dot_dimension_numbers<[1], [0], [0], [1], [0, 0, 1, 1], [], []>} : vector<8x36xf32>, vector<36x256xf32>, vector<8x256xf32> -> vector<8x256xf32>
    %c0_6 = arith.constant 0 : index
    %c0_7 = arith.constant 0 : index
    %c0_8 = arith.constant 0 : index
    %6 = vector.load %arg5[%c0_6, %c0_7, %c0_8] : memref<2x8x256xf32, #tpu.memory_space<vmem>>, vector<1x8x256xf32>
    %7 = vector.shape_cast %6 : vector<1x8x256xf32> to vector<8x256xf32>
    %8 = vector.shape_cast %5 : vector<8x256xf32> to vector<1x8x256xf32>
    tpu.vector_store %arg5[%c0_6, %c0_7, %c0_8], %8 {strides = array<i32>} : memref<2x8x256xf32, #tpu.memory_space<vmem>>, vector<1x8x256xf32>,
    %cst_9 = arith.constant dense<0.000000e+00> : vector<8xf32>
    %9 = vector.multi_reduction <add>, %5, %cst_9 [1] : vector<8x256xf32> to vector<8xf32>
    %10 = vector.shape_cast %9 : vector<8xf32> to vector<8x1xf32>
    %11 = arith.addf %1, %10 : vector<8x1xf32>
    %12 = arith.mulf %5, %5 : vector<8x256xf32>
    %cst_10 = arith.constant dense<0.000000e+00> : vector<8xf32>
    %13 = vector.multi_reduction <add>, %12, %cst_10 [1] : vector<8x256xf32> to vector<8xf32>
    %14 = vector.shape_cast %13 : vector<8xf32> to vector<8x1xf32>
    %15 = arith.addf %2, %14 : vector<8x1xf32>
    %c1 = arith.constant 1 : index
    %c0_11 = arith.constant 0 : index
    %c0_12 = arith.constant 0 : index
    %16 = vector.load %arg1[%c1, %c0_11, %c0_12] : memref<2x36x256xf32, #tpu.memory_space<vmem>>, vector<1x36x256xf32>
    %17 = vector.shape_cast %16 : vector<1x36x256xf32> to vector<36x256xf32>
    %cst_13 = arith.constant dense<0.000000e+00> : vector<8x256xf32>
    %18 = tpu.matmul %0, %17, %cst_13 {dimension_numbers = #tpu.dot_dimension_numbers<[1], [0], [0], [1], [0, 0, 1, 1], [], []>} : vector<8x36xf32>, vector<36x256xf32>, vector<8x256xf32> -> vector<8x256xf32>
    %c1_14 = arith.constant 1 : index
    %c0_15 = arith.constant 0 : index
    %c0_16 = arith.constant 0 : index
    %19 = vector.load %arg5[%c1_14, %c0_15, %c0_16] : memref<2x8x256xf32, #tpu.memory_space<vmem>>, vector<1x8x256xf32>
    %20 = vector.shape_cast %19 : vector<1x8x256xf32> to vector<8x256xf32>
    %21 = vector.shape_cast %18 : vector<8x256xf32> to vector<1x8x256xf32>
    tpu.vector_store %arg5[%c1_14, %c0_15, %c0_16], %21 {strides = array<i32>} : memref<2x8x256xf32, #tpu.memory_space<vmem>>, vector<1x8x256xf32>,
    %cst_17 = arith.constant dense<0.000000e+00> : vector<8xf32>
    %22 = vector.multi_reduction <add>, %18, %cst_17 [1] : vector<8x256xf32> to vector<8xf32>
    %23 = vector.shape_cast %22 : vector<8xf32> to vector<8x1xf32>
    %24 = arith.addf %11, %23 : vector<8x1xf32>
    %25 = arith.mulf %18, %18 : vector<8x256xf32>
    %cst_18 = arith.constant dense<0.000000e+00> : vector<8xf32>
    %26 = vector.multi_reduction <add>, %25, %cst_18 [1] : vector<8x256xf32> to vector<8xf32>
    %27 = vector.shape_cast %26 : vector<8xf32> to vector<8x1xf32>
    %28 = arith.addf %15, %27 : vector<8x1xf32>
    %cst_19 = arith.constant 0.001953125 : f32
    %29 = vector.broadcast %cst_19 : f32 to vector<8x1xf32>
    %30 = arith.mulf %24, %29 : vector<8x1xf32>
    %cst_20 = arith.constant 0.001953125 : f32
    %31 = vector.broadcast %cst_20 : f32 to vector<8x1xf32>
    %32 = arith.mulf %28, %31 : vector<8x1xf32>
    %33 = arith.mulf %30, %30 : vector<8x1xf32>
    %34 = arith.subf %32, %33 : vector<8x1xf32>
    %cst_21 = arith.constant 9.99999974E-6 : f32
    %35 = vector.broadcast %cst_21 : f32 to vector<8x1xf32>
    %36 = arith.addf %34, %35 : vector<8x1xf32>
    %37 = math.rsqrt %36 : vector<8x1xf32>
    %c0_22 = arith.constant 0 : index
    %c0_23 = arith.constant 0 : index
    %38 = vector.load %arg3[%c0_22, %c0_23] : memref<8x1xf32, #tpu.memory_space<vmem>>, vector<8x1xf32>
    %39 = arith.mulf %38, %37 : vector<8x1xf32>
    %c0_24 = arith.constant 0 : index
    %c0_25 = arith.constant 0 : index
    %40 = vector.load %arg4[%c0_24, %c0_25] : memref<8x1xf32, #tpu.memory_space<vmem>>, vector<8x1xf32>
    %41 = arith.mulf %30, %39 : vector<8x1xf32>
    %42 = arith.subf %40, %41 : vector<8x1xf32>
    %c0_26 = arith.constant 0 : index
    %c0_27 = arith.constant 0 : index
    %c0_28 = arith.constant 0 : index
    %43 = vector.load %arg5[%c0_26, %c0_27, %c0_28] : memref<2x8x256xf32, #tpu.memory_space<vmem>>, vector<1x8x256xf32>
    %44 = vector.shape_cast %43 : vector<1x8x256xf32> to vector<8x256xf32>
    %45 = vector.broadcast %39 : vector<8x1xf32> to vector<8x256xf32>
    %46 = arith.mulf %44, %45 : vector<8x256xf32>
    %47 = vector.broadcast %42 : vector<8x1xf32> to vector<8x256xf32>
    %48 = arith.addf %46, %47 : vector<8x256xf32>
    %cst_29 = arith.constant 0.000000e+00 : f32
    %49 = vector.broadcast %cst_29 : f32 to vector<8x256xf32>
    %50 = arith.maximumf %48, %49 : vector<8x256xf32>
    %c0_30 = arith.constant 0 : index
    %c0_31 = arith.constant 0 : index
    %c0_32 = arith.constant 0 : index
    %51 = vector.load %arg5[%c0_30, %c0_31, %c0_32] : memref<2x8x256xf32, #tpu.memory_space<vmem>>, vector<1x8x256xf32>
    %52 = vector.shape_cast %51 : vector<1x8x256xf32> to vector<8x256xf32>
    %53 = vector.shape_cast %50 : vector<8x256xf32> to vector<1x8x256xf32>
    tpu.vector_store %arg5[%c0_30, %c0_31, %c0_32], %53 {strides = array<i32>} : memref<2x8x256xf32, #tpu.memory_space<vmem>>, vector<1x8x256xf32>,
    %c1_33 = arith.constant 1 : index
    %c0_34 = arith.constant 0 : index
    %c0_35 = arith.constant 0 : index
    %54 = vector.load %arg5[%c1_33, %c0_34, %c0_35] : memref<2x8x256xf32, #tpu.memory_space<vmem>>, vector<1x8x256xf32>
    %55 = vector.shape_cast %54 : vector<1x8x256xf32> to vector<8x256xf32>
    %56 = vector.broadcast %39 : vector<8x1xf32> to vector<8x256xf32>
    %57 = arith.mulf %55, %56 : vector<8x256xf32>
    %58 = vector.broadcast %42 : vector<8x1xf32> to vector<8x256xf32>
    %59 = arith.addf %57, %58 : vector<8x256xf32>
    %cst_36 = arith.constant 0.000000e+00 : f32
    %60 = vector.broadcast %cst_36 : f32 to vector<8x256xf32>
    %61 = arith.maximumf %59, %60 : vector<8x256xf32>
    %c1_37 = arith.constant 1 : index
    %c0_38 = arith.constant 0 : index
    %c0_39 = arith.constant 0 : index
    %62 = vector.load %arg5[%c1_37, %c0_38, %c0_39] : memref<2x8x256xf32, #tpu.memory_space<vmem>>, vector<1x8x256xf32>
    %63 = vector.shape_cast %62 : vector<1x8x256xf32> to vector<8x256xf32>
    %64 = vector.shape_cast %61 : vector<8x256xf32> to vector<1x8x256xf32>
    tpu.vector_store %arg5[%c1_37, %c0_38, %c0_39], %64 {strides = array<i32>} : memref<2x8x256xf32, #tpu.memory_space<vmem>>, vector<1x8x256xf32>,
    return
  }
  func.func @transform_0(%arg0: i32) -> (i32, i32, i32) {
    %c0_i32 = arith.constant 0 : i32
    %c0_i32_0 = arith.constant 0 : i32
    %c0_i32_1 = arith.constant 0 : i32
    %c0_i32_2 = arith.constant 0 : i32
    return %c0_i32, %c0_i32_0, %c0_i32_1 : i32, i32, i32
  }
  func.func @transform_1(%arg0: i32) -> (i32, i32) {
    %c0_i32 = arith.constant 0 : i32
    %c0_i32_0 = arith.constant 0 : i32
    %c0_i32_1 = arith.constant 0 : i32
    return %c0_i32, %c0_i32_0 : i32, i32
  }
  func.func @transform_2(%arg0: i32) -> (i32, i32) {
    %c0_i32 = arith.constant 0 : i32
    %c0_i32_0 = arith.constant 0 : i32
    %c0_i32_1 = arith.constant 0 : i32
    return %c0_i32, %c0_i32_0 : i32, i32
  }
  func.func @transform_3(%arg0: i32) -> (i32, i32) {
    %c0_i32 = arith.constant 0 : i32
    %c0_i32_0 = arith.constant 0 : i32
    %c0_i32_1 = arith.constant 0 : i32
    return %c0_i32, %c0_i32_0 : i32, i32
  }
  func.func @transform_4(%arg0: i32) -> (i32, i32, i32) {
    %c0_i32 = arith.constant 0 : i32
    %c0_i32_0 = arith.constant 0 : i32
    %c0_i32_1 = arith.constant 0 : i32
    %c0_i32_2 = arith.constant 0 : i32
    return %c0_i32, %c0_i32_0, %c0_i32_1 : i32, i32, i32
  }
}

</mosaic_0001>

<bundles_post_ra>
// kernel: conv_brunch_forward.1
= control target key start
LH: loop header
LB: loop body
LE: loop exit
PB: predicated region body
PF: predicated region fallthrough
CT: control target
= control target key end

     0   :  { %vm32_vm0 = vcmask 1043456   ;;  %vm28_vm1 = vcmask 293888   ;;  %v244_v33 = vmov 0   ;;  %s351_s0 = inlined_call_operand.vmem [shape: f32[2,36,256], index: 0, kind: input, shape index: {}]   ;;  %s352_s1 = inlined_call_operand.vmem [shape: f32[8,36], index: 1, kind: input, shape index: {}]   ;;  %s353_s2 = inlined_call_operand.vmem [shape: f32[8,1], index: 2, kind: input, shape index: {}]   ;;  %s354_s3 = inlined_call_operand.vmem [shape: f32[8,1], index: 3, kind: input, shape index: {}]   ;;  %s355_s4 = inlined_call_operand.vmem [shape: f32[2,8,256], index: 4, kind: output, shape index: {}]  }
   0x1   :  { %v26_v0 = vld [vmem:[%s351_s0 + $0x40] sm:$0xf]  ;;  %v27_v1 = vld [vmem:[%s351_s0 + $0x48] sm:$0xf]  ;;  %v24_v2 = vld [vmem:[%s351_s0 + $0x30] sm:$0xff]  ;;  %240 = vset.pattern.permute.xlu2 %v244_v33  ;;  %241 = vset.pattern.permute.xlu0 %v244_v33 }
   0x2   :  { %215 = vmatpush.msk.msra.mxu0 %vm32_vm0, %v26_v0  ;;  %217 = vmatpush.msk.msra.mxu1 %vm32_vm0, %v27_v1  ;;  %v25_v3 = vld [vmem:[%s351_s0 + $0x38] sm:$0xff]  ;;  %v227_v4 = vld [vmem:[%s351_s0 + $0x90] sm:$0xf]  ;;  %v22_v6 = vld [vmem:[%s351_s0 + $0x20] sm:$0xff] }
   0x3   :  { %v228_v5 = vld [vmem:[%s351_s0 + $0x98] sm:$0xf]  ;;  %229 = vmatpush.msk.msra.mxu2 %vm32_vm0, %v227_v4  ;;  %v23_v7 = vld [vmem:[%s351_s0 + $0x28] sm:$0xff]  ;;  %v225_v8 = vld [vmem:[%s351_s0 + $0x80] sm:$0xff] }
   0x4   :  { %231 = vmatpush.msk.msra.mxu3 %vm32_vm0, %v228_v5  ;;  %51 = vmatpush.msra.mxu0 %v24_v2  ;;  %v226_v9 = vld [vmem:[%s351_s0 + $0x88] sm:$0xff]  ;;  %v20_v10 = vld [vmem:[%s351_s0 + $0x10] sm:$0xff]  ;;  %v21_v11 = vld [vmem:[%s351_s0 + $0x18] sm:$0xff] }
   0x5   :  { %71 = vmatpush.msra.mxu1 %v25_v3  ;;  %120 = vmatpush.msra.mxu2 %v225_v8  ;;  %v223_v12 = vld [vmem:[%s351_s0 + $0x70] sm:$0xff]  ;;  %v224_v13 = vld [vmem:[%s351_s0 + $0x78] sm:$0xff]  ;;  %v221_v14 = vld [vmem:[%s351_s0 + $0x60] sm:$0xff] }
   0x6   :  { %140 = vmatpush.msra.mxu3 %v226_v9  ;;  %52 = vmatpush.msra.mxu0 %v22_v6  ;;  %v222_v15 = vld [vmem:[%s351_s0 + $0x68] sm:$0xff]  ;;  %v18_v16 = vld [vmem:[%s351_s0] sm:$0xff]  ;;  %v219_v19 = vld [vmem:[%s351_s0 + $0x50] sm:$0xff] }
   0x7   :  { %72 = vmatpush.msra.mxu1 %v23_v7  ;;  %121 = vmatpush.msra.mxu2 %v223_v12  ;;  %v19_v17 = vld [vmem:[%s351_s0 + $0x8] sm:$0xff]  ;;  %v17_v18 = vld [vmem:[%s352_s1] sm:$0xff]  ;;  %v220_v20 = vld [vmem:[%s351_s0 + $0x58] sm:$0xff] }
   0x8   :  { %141 = vmatpush.msra.mxu3 %v224_v13  ;;  %53 = vmatpush.msra.mxu0 %v20_v10  ;;  %v176_v51 = vld [vmem:[%s353_s2] sm:$0xff] }
   0x9   :  { %73 = vmatpush.msra.mxu1 %v21_v11  ;;  %122 = vmatpush.msra.mxu2 %v221_v14  ;;  %v178_v55 = vld [vmem:[%s354_s3] sm:$0xff] }
   0xa   :  { %142 = vmatpush.msra.mxu3 %v222_v15  ;;  %54 = vmatpush.msra.mxu0 %v18_v16 }
   0xb   :  { %74 = vmatpush.msra.mxu1 %v19_v17  ;;  %216 = vmatmul.msk.f32.vlgmr.msra.gmra.mxu0 %vm28_vm1, %v17_v18 }
   0xc   :  { %218 = vmatmul.msk.f32.vlgmr.msra.gmra.mxu1 %vm28_vm1, %v17_v18  ;;  %123 = vmatpush.msra.mxu2 %v219_v19 }
   0xd   :  { %143 = vmatpush.msra.mxu3 %v220_v20  ;;  %230 = vmatmul.msk.f32.vlgmr.msra.gmra.mxu2 %vm28_vm1, %v17_v18 }
   0xe   :  { %232 = vmatmul.msk.f32.vlgmr.msra.gmra.mxu3 %vm28_vm1, %v17_v18 }
  0x88   :  { %v56_v21 = vpop.f32.mrf.mxu0 }
  0x89   :  { %v76_v22 = vpop.f32.mrf.mxu1  ;;  %v85_v23 = vmul.f32 %v56_v21, %v56_v21 }
  0x8a   :  { %v86_v24 = vmul.f32 %v76_v22, %v76_v22  ;;  %v81_v25 = vadd.f32 %v76_v22, %v56_v21 }
  0x8c   :  { %82 = vadd.xlane.f32.xlu0 %v81_v25  ;;  %v87_v26 = vadd.f32 %v86_v24, %v85_v23 }
  0x8e   :  { %88 = vadd.xlane.f32.xlu1 %v87_v26 }
  0x90   :  { %v125_v27 = vpop.f32.mrf.mxu2 }
  0x91   :  { %v145_v28 = vpop.f32.mrf.mxu3  ;;  %v155_v29 = vmul.f32 %v125_v27, %v125_v27 }
  0x92   :  { %v156_v30 = vmul.f32 %v145_v28, %v145_v28  ;;  %v151_v31 = vadd.f32 %v145_v28, %v125_v27 }
  0x94   :  { %152 = vadd.xlane.f32.xlu0 %v151_v31  ;;  %v157_v32 = vadd.f32 %v156_v30, %v155_v29 }
  0x96   :  { %158 = vadd.xlane.f32.xlu1 %v157_v32 }
  0xff   :  { %v83_v34 = vpop.xlane.xlu0 %82 }
 0x101   :  { %v89_v35 = vpop.xlane.xlu1 %88 }
 0x107   :  { %v153_v36 = vpop.xlane.xlu0 %152 }
 0x108   :  { %v154_v37 = vadd.f32 %v153_v36, %v83_v34 }
 0x109   :  { %v159_v38 = vpop.xlane.xlu1 %158 }
 0x10a   :  { %v161_v39 = vmul.f32 0.001953125, %v154_v37  ;;  %v160_v40 = vadd.f32 %v159_v38, %v89_v35 }
 0x10c   :  { %v163_v41 = vmul.f32 %v161_v39, %v161_v39  ;;  %v162_v42 = vmul.f32 0.001953125, %v160_v40 }
 0x10e   :  { %v164_v43 = vsub.f32 %v162_v42, %v163_v41 }
 0x110   :  { %v165_v44 = vadd.f32 1e-05, %v164_v43 }
 0x112   :  { %242 = vrsqrt.f32 %v165_v44  ;;  %vm172_vm3 = vweird.f32 %v165_v44 }
 0x118   :  { %v243_v45 = vpop.eup %242 }
 0x119   :  { %v167_v46 = vmul.f32 %v243_v45, %v165_v44  ;;  %vm173_vm2 = vweird.f32 %v243_v45 }
 0x11a   :  { %vm174_vm4 = vmor %vm172_vm3, %vm173_vm2 }
 0x11b   :  { %v168_v47 = vmul.f32 %v243_v45, %v167_v46 }
 0x11d   :  { %v169_v48 = vmul.f32 0.5, %v168_v47 }
 0x11f   :  { %v170_v49 = vsub.f32 1.5, %v169_v48 }
 0x121   :  { %v171_v50 = vmul.f32 %v243_v45, %v170_v49 }
 0x123   :  { %v175_v52 = vsel %vm174_vm4, %v243_v45, %v171_v50 }
 0x124   :  { %v177_v53 = vmul.f32 %v176_v51, %v175_v52 }
 0x126   :  { %185 = vperm.xlu2 %240, %v177_v53   ;;  %v179_v54 = vmul.f32 %v177_v53, %v161_v39 }
 0x128   :  { %v180_v56 = vsub.f32 %v178_v55, %v179_v54 }
 0x12e   :  { %192 = vperm.xlu2 %240, %v180_v56  }
 0x180   :  { %v186_v57 = vpop.permute.xlu2 %185 }
 0x181   :  { %v189_v58 = vmul.f32 %v186_v57, %v76_v22  ;;  %v203_v59 = vmul.f32 %v186_v57, %v125_v27  ;;  %v204_v60 = vmul.f32 %v186_v57, %v145_v28  ;;  %v188_v61 = vmul.f32 %v186_v57, %v56_v21 }
 0x188   :  { %v193_v62 = vpop.permute.xlu2 %192 }
 0x189   :  { %v195_v63 = vadd.f32 %v193_v62, %v188_v61  ;;  %v196_v0 = vadd.f32 %v193_v62, %v189_v58  ;;  %v205_v1 = vadd.f32 %v203_v59, %v193_v62  ;;  %v206_v2 = vadd.f32 %v204_v60, %v193_v62 }
 0x18b   :  { %v197_v3 = vmax.f32 %v195_v63, 0.0  ;;  %v198_v4 = vmax.f32 %v196_v0, 0.0  ;;  %v207_v5 = vmax.f32 %v205_v1, 0.0  ;;  %v208_v6 = vmax.f32 %v206_v2, 0.0 }
 0x18d   :  { %199 = vst [vmem:[%s355_s4] sm:$0xff] %v197_v3 }
 0x18e   :  { %200 = vst [vmem:[%s355_s4 + $0x8] sm:$0xff] %v198_v4 }
 0x18f   :  { %237 = vst [vmem:[%s355_s4 + $0x10] sm:$0xff] %v207_v5 }
 0x190   :  { %238 = vst [vmem:[%s355_s4 + $0x18] sm:$0xff] %v208_v6 }

</bundles_post_ra>
